<compile_context>
chip_gen: v7x
topology: tpu7x:2x2x1
jax: 0.10.0
libtpu: 0.0.40
codegen_flags: <defaults>
</compile_context>

<pallas_src>
import functools

import jax
import jax.numpy as jnp
from jax.experimental import pallas as pl
from jax.experimental.pallas import tpu as pltpu


def _ln_kernel_bias(x_ref, w_ref, b_ref, o_ref, *, eps):
    # x_ref: (tile_rows, D); w_ref/b_ref: (1, D)
    x = x_ref[...].astype(jnp.float32)
    mean = jnp.mean(x, axis=-1, keepdims=True)
    xc = x - mean
    var = jnp.mean(xc * xc, axis=-1, keepdims=True)  # biased variance (layer_norm)
    inv = jax.lax.rsqrt(var + eps)
    y = xc * inv
    y = y * w_ref[...].astype(jnp.float32) + b_ref[...].astype(jnp.float32)
    o_ref[...] = y.astype(o_ref.dtype)


def _ln_kernel_nobias(x_ref, w_ref, o_ref, *, eps):
    x = x_ref[...].astype(jnp.float32)
    mean = jnp.mean(x, axis=-1, keepdims=True)
    xc = x - mean
    var = jnp.mean(xc * xc, axis=-1, keepdims=True)
    inv = jax.lax.rsqrt(var + eps)
    o_ref[...] = (xc * inv * w_ref[...].astype(jnp.float32)).astype(o_ref.dtype)


def _pick_tile_rows(n_rows, d, itemsize, *, target_block_bytes=2 << 20,
                    min_rows=8, max_rows=1024, min_grid=4):
    """Largest row-tile that (a) keeps blocks ~target_block_bytes, (b) is a
    multiple of 8 sublanes, (c) fits the problem, (d) leaves >= min_grid grid
    steps when possible (feeds both TensorCores on v7x)."""
    # Size by the f32 compute working set (matters for bf16 inputs, esp. v5e).
    bytes_per_row = d * max(4, int(itemsize))
    rows = target_block_bytes // max(1, bytes_per_row)
    rows = int(max(min_rows, min(max_rows, rows)))
    rows = max(min_rows, (rows // 8) * 8)
    # Never bigger than the whole (sublane-rounded) problem.
    rows_cap = ((n_rows + 7) // 8) * 8
    rows = min(rows, max(min_rows, rows_cap))
    # Keep a few grid steps so the "parallel" axis can be sharded across TCs.
    while (rows > min_rows
           and pl.cdiv(n_rows, rows) < min_grid
           and n_rows > min_grid * min_rows):
        rows = max(min_rows, ((rows // 2) // 8) * 8)
    return rows


def layer_norm_pallas(x, weight, bias=None, eps=1e-5, tile_rows=None):
    """LayerNorm over the last dim of x. Glue reshapes are plain JAX (views)."""
    orig_shape = x.shape
    d = orig_shape[-1]
    x2 = x.reshape(-1, d)
    n_rows = x2.shape[0]

    if tile_rows is None:
        tile_rows = _pick_tile_rows(n_rows, d, jnp.dtype(x.dtype).itemsize)

    grid = (pl.cdiv(n_rows, tile_rows),)  # ragged last block handled by Pallas

    w2 = weight.reshape(1, d)
    in_specs = [
        pl.BlockSpec((tile_rows, d), lambda i: (i, 0)),
        pl.BlockSpec((1, d), lambda i: (0, 0)),
    ]
    args = [x2, w2]
    if bias is not None:
        in_specs.append(pl.BlockSpec((1, d), lambda i: (0, 0)))
        args.append(bias.reshape(1, d))
        kernel = functools.partial(_ln_kernel_bias, eps=eps)
    else:
        kernel = functools.partial(_ln_kernel_nobias, eps=eps)

    # TODO(synk): for best lane utilization D should be a multiple of 128; short
    # feature dims (like the 32-wide demo) run with masked partial stores.
    out = pl.pallas_call(
        kernel,
        out_shape=jax.ShapeDtypeStruct((n_rows, d), x.dtype),
        grid_spec=pltpu.PrefetchScalarGridSpec(
            num_scalar_prefetch=0,
            grid=grid,
            in_specs=in_specs,
            out_specs=pl.BlockSpec((tile_rows, d), lambda i: (i, 0)),
        ),
        compiler_params=pltpu.CompilerParams(
            dimension_semantics=("parallel",),
            vmem_limit_bytes=32 << 20,  # safe on v5e/v6e/v7x; blocks use far less
        ),
    )(*args)

    return out.reshape(orig_shape)


def _reference(x, weight, bias, eps=1e-5):
    mean = jnp.mean(x, axis=-1, keepdims=True)
    var = jnp.mean((x - mean) ** 2, axis=-1, keepdims=True)
    y = (x - mean) * jax.lax.rsqrt(var + eps) * weight
    if bias is not None:
        y = y + bias
    return y


if __name__ == "__main__":
    key = jax.random.PRNGKey(0)
    batch, seq, hidden = 2, 8, 32

    x = jax.random.normal(key, (batch, seq, hidden), dtype=jnp.float32)

    # nn.Parameter(torch.ones(ndim)) / torch.zeros(ndim)
    weight = jnp.ones((hidden,), dtype=jnp.float32)
    bias = jnp.zeros((hidden,), dtype=jnp.float32)

    # with bias
    y = jax.block_until_ready(layer_norm_pallas(x, weight, bias))
    ref = _reference(x, weight, bias)
    assert jnp.allclose(y, ref, atol=1e-5, rtol=1e-5), "mismatch vs reference (bias)"

    # bias=False path (specialized kernel, no zero-bias materialization)
    y_nb = jax.block_until_ready(layer_norm_pallas(x, weight, None))
    ref_nb = _reference(x, weight, None)
    assert jnp.allclose(y_nb, ref_nb, atol=1e-5, rtol=1e-5), "mismatch vs reference (no bias)"

    print("KERNEL_OK")
</pallas_src>

<mosaic_0001>
module attributes {stable_mosaic.version = 11 : i64} {
  func.func @_ln_kernel_bias(%arg0: i32, %arg1: memref<16x32xf32, #tpu.memory_space<vmem>>, %arg2: memref<1x32xf32, #tpu.memory_space<vmem>>, %arg3: memref<1x32xf32, #tpu.memory_space<vmem>>, %arg4: memref<16x32xf32, #tpu.memory_space<vmem>>) attributes {dimension_semantics = [#tpu.dimension_semantics<parallel>], iteration_bounds = array<i64: 1>, scalar_prefetch = 0 : i64, scratch_operands = 0 : i64, tpu.core_type = #tpu.core_type<tc>, window_params = [{transform_indices = @transform_0, window_bounds = array<i64: 16, 32>}, {pipeline_mode = #tpu.pipeline_mode<synchronous>, transform_indices = @transform_1, window_bounds = array<i64: 1, 32>}, {pipeline_mode = #tpu.pipeline_mode<synchronous>, transform_indices = @transform_2, window_bounds = array<i64: 1, 32>}, {transform_indices = @transform_3, window_bounds = array<i64: 16, 32>}]} {
    %c0 = arith.constant 0 : index
    %c0_0 = arith.constant 0 : index
    %0 = vector.load %arg1[%c0, %c0_0] : memref<16x32xf32, #tpu.memory_space<vmem>>, vector<16x32xf32>
    %cst = arith.constant dense<0.000000e+00> : vector<16xf32>
    %1 = vector.multi_reduction <add>, %0, %cst [1] : vector<16x32xf32> to vector<16xf32>
    %2 = vector.shape_cast %1 : vector<16xf32> to vector<16x1xf32>
    %cst_1 = arith.constant 3.200000e+01 : f32
    %3 = vector.broadcast %cst_1 : f32 to vector<16x1xf32>
    %4 = arith.divf %2, %3 : vector<16x1xf32>
    %5 = vector.broadcast %4 : vector<16x1xf32> to vector<16x32xf32>
    %6 = arith.subf %0, %5 : vector<16x32xf32>
    %7 = arith.mulf %6, %6 : vector<16x32xf32>
    %cst_2 = arith.constant dense<0.000000e+00> : vector<16xf32>
    %8 = vector.multi_reduction <add>, %7, %cst_2 [1] : vector<16x32xf32> to vector<16xf32>
    %9 = vector.shape_cast %8 : vector<16xf32> to vector<16x1xf32>
    %cst_3 = arith.constant 3.200000e+01 : f32
    %10 = vector.broadcast %cst_3 : f32 to vector<16x1xf32>
    %11 = arith.divf %9, %10 : vector<16x1xf32>
    %cst_4 = arith.constant 9.99999974E-6 : f32
    %12 = vector.broadcast %cst_4 : f32 to vector<16x1xf32>
    %13 = arith.addf %11, %12 : vector<16x1xf32>
    %14 = math.rsqrt %13 : vector<16x1xf32>
    %15 = vector.broadcast %14 : vector<16x1xf32> to vector<16x32xf32>
    %16 = arith.mulf %6, %15 : vector<16x32xf32>
    %c0_5 = arith.constant 0 : index
    %c0_6 = arith.constant 0 : index
    %17 = vector.load %arg2[%c0_5, %c0_6] : memref<1x32xf32, #tpu.memory_space<vmem>>, vector<1x32xf32>
    %18 = vector.broadcast %17 : vector<1x32xf32> to vector<16x32xf32>
    %19 = arith.mulf %16, %18 : vector<16x32xf32>
    %c0_7 = arith.constant 0 : index
    %c0_8 = arith.constant 0 : index
    %20 = vector.load %arg3[%c0_7, %c0_8] : memref<1x32xf32, #tpu.memory_space<vmem>>, vector<1x32xf32>
    %21 = vector.broadcast %20 : vector<1x32xf32> to vector<16x32xf32>
    %22 = arith.addf %19, %21 : vector<16x32xf32>
    %c0_9 = arith.constant 0 : index
    %c0_10 = arith.constant 0 : index
    %23 = vector.load %arg4[%c0_9, %c0_10] : memref<16x32xf32, #tpu.memory_space<vmem>>, vector<16x32xf32>
    tpu.vector_store %arg4[%c0_9, %c0_10], %22 {strides = array<i32>} : memref<16x32xf32, #tpu.memory_space<vmem>>, vector<16x32xf32>,
    return
  }
  func.func @transform_0(%arg0: i32) -> (i32, i32) {
    %c0_i32 = arith.constant 0 : i32
    %c0_i32_0 = arith.constant 0 : i32
    return %arg0, %c0_i32 : i32, i32
  }
  func.func @transform_1(%arg0: i32) -> (i32, i32) {
    %c0_i32 = arith.constant 0 : i32
    %c0_i32_0 = arith.constant 0 : i32
    %c0_i32_1 = arith.constant 0 : i32
    return %c0_i32, %c0_i32_0 : i32, i32
  }
  func.func @transform_2(%arg0: i32) -> (i32, i32) {
    %c0_i32 = arith.constant 0 : i32
    %c0_i32_0 = arith.constant 0 : i32
    %c0_i32_1 = arith.constant 0 : i32
    return %c0_i32, %c0_i32_0 : i32, i32
  }
  func.func @transform_3(%arg0: i32) -> (i32, i32) {
    %c0_i32 = arith.constant 0 : i32
    %c0_i32_0 = arith.constant 0 : i32
    return %arg0, %c0_i32 : i32, i32
  }
}

</mosaic_0001>

<bundles_post_ra>
// kernel: tpu_custom_call.1
= control target key start
LH: loop header
LB: loop body
LE: loop exit
PB: predicated region body
PF: predicated region fallthrough
CT: control target
= control target key end

     0   :  { %8 = vsyncpa [#allocation3], 0  ;;  %s220_s0 = inlined_call_operand.hbm [shape: f32[16,32], index: 0, kind: input, shape index: {}]   ;;  %s221_s1 = inlined_call_operand.vmem [shape: f32[1,32], index: 1, kind: input, shape index: {}]   ;;  %s222_s2 = inlined_call_operand.vmem [shape: f32[1,32], index: 2, kind: input, shape index: {}]   ;;  %s223_s3 = inlined_call_operand.hbm [shape: f32[16,32], index: 3, kind: output, shape index: {}]  }
   0x1   :  { %9 = vsyncpa [#allocation4], 0  ;;  %s154_s12 = smov [#allocation2]   ;;  %s106_s16 = scalar_lea.hbm %s220_s0, 256 }
   0x2   :  { %s15_s13 = sshll.u32 %s154_s12, 4  ;;  %p107_p0 = scmp.ne.s32.totalorder %s220_s0, %s106_s16  ;;  %s16_s13 = int_to_ptr.vmem [resolvable:$true] %s15_s13 }
   0x3   :  { %p110_p1 = scmp.lt.u32.totalorder %s106_s16, %s220_s0 }
   0x5   :  { %p112_p2 = pnand %p110_p1, %p107_p0 }
   0x7   :  { %115 = shalt.err (!%p112_p2)
}
   0x8   :  { %s116_s21 = scalar_lea.vmem %s16_s13, 256  ;;  %p121_p4 = scmp.lt.s32.totalorder %s16_s13, %s16_s13 }
   0x9   :  { %p117_p3 = scmp.ne.s32.totalorder %s16_s13, %s116_s21  ;;  %p122_p5 = scmp.lt.s32.totalorder %s116_s21, %s116_s21 }
   0xb   :  { %p123_p6 = por %p122_p5, %p121_p4 }
   0xd   :  { %p124_p7 = pnand %p123_p6, %p117_p3 }
   0xf   :  { %127 = shalt.err (!%p124_p7)
}
  0x10   :  { %s155_s22 = smov 128   ;;  %s156_s23 = smov 8  }
  0x11   :  { %21 = dma.hbm_to_vmem [thread:$0]  %s220_s0, 256, %s16_s13, [#allocation3], %s155_s22, %s155_s22, %s156_s23  }
  0x12   :  { %150 = dma.done.wait [#allocation3], 256  }
  0x13   :  { %151 = vsyncadd [#allocation3], 4294967040  ;;  %vm31_vm0 = vcmask 261120   ;;  %v29_v0 = vld [vmem:[#allocation2] sm:$0xff]  ;;  %v30_v1 = vld [vmem:[#allocation2 + $0x8] sm:$0xff]  ;;  %s157_s29 = smov [#allocation5]  }
  0x14   :  { %v32_v2 = vsel %vm31_vm0, %v29_v0, 0.0  ;;  %v35_v3 = vsel %vm31_vm0, %v30_v1, 0.0  ;;  %v96_v21 = vld [vmem:[%s221_s1] ss:$0 sm:$0xff]  ;;  %s84_s30 = sshll.u32 %s157_s29, 4  ;;  %s85_s30 = int_to_ptr.vmem [resolvable:$true] %s84_s30 }
  0x15   :  { %33 = vadd.xlane.f32.xlu0 %v32_v2  ;;  %v97_v23 = vld [vmem:[%s222_s2] ss:$0 sm:$0xff]  ;;  %s128_s4 = scalar_lea.vmem %s85_s30, 256  ;;  %p133_p9 = scmp.lt.s32.totalorder %s85_s30, %s85_s30 }
  0x16   :  { %p129_p8 = scmp.ne.s32.totalorder %s85_s30, %s128_s4  ;;  %p134_p10 = scmp.lt.s32.totalorder %s128_s4, %s128_s4 }
  0x18   :  { %p135_p11 = por %p134_p10, %p133_p9 }
  0x19   :  { %36 = vadd.xlane.f32.xlu0 %v35_v3 }
  0x1a   :  { %p136_p12 = pnand %p135_p11, %p129_p8 }
  0xa2   :  { %v34_v4 = vpop.xlane.xlu0 %33 }
  0xa3   :  { %v39_v5 = vmul.f32 0.03125, %v34_v4 }
  0xa5   :  { %v41_v6 = vsub.f32 %v29_v0, %v39_v5 }
  0xa6   :  { %v37_v7 = vpop.xlane.xlu0 %36 }
  0xa7   :  { %v40_v8 = vmul.f32 0.03125, %v37_v7  ;;  %v43_v9 = vmul.f32 %v41_v6, %v41_v6 }
  0xa9   :  { %v42_v10 = vsub.f32 %v30_v1, %v40_v8  ;;  %v45_v11 = vsel %vm31_vm0, %v43_v9, 0.0 }
  0xaa   :  { %46 = vadd.xlane.f32.xlu1 %v45_v11 }
  0xab   :  { %v44_v12 = vmul.f32 %v42_v10, %v42_v10 }
  0xad   :  { %v48_v13 = vsel %vm31_vm0, %v44_v12, 0.0 }
  0xae   :  { %49 = vadd.xlane.f32.xlu1 %v48_v13 }
 0x137   :  { %v47_v14 = vpop.xlane.xlu1 %46 }
 0x138   :  { %v51_v15 = vmul.f32 0.03125, %v47_v14 }
 0x13a   :  { %v53_v16 = vadd.f32 1e-05, %v51_v15 }
 0x13b   :  { %v50_v17 = vpop.xlane.xlu1 %49 }
 0x13c   :  { %102 = vrsqrt.f32 %v53_v16  ;;  %v52_v18 = vmul.f32 0.03125, %v50_v17 }
 0x13e   :  { %v54_v19 = vadd.f32 1e-05, %v52_v18 }
 0x140   :  { %104 = vrsqrt.f32 %v54_v19 }
 0x146   :  { %v103_v20 = vpop.eup %102 }
 0x147   :  { %v57_v22 = vmul.f32 %v103_v20, %v41_v6 }
 0x149   :  { %v66_v24 = vmul.f32 %v96_v21, %v57_v22 }
 0x14a   :  { %v105_v25 = vpop.eup %104 }
 0x14b   :  { %v58_v26 = vmul.f32 %v105_v25, %v42_v10  ;;  %v75_v27 = vadd.f32 %v97_v23, %v66_v24 }
 0x14d   :  { %v67_v28 = vmul.f32 %v96_v21, %v58_v26  ;;  %77 = vst.msk [vmem:[#allocation5] sm:$0xff] %vm31_vm0, %v75_v27 }
 0x14f   :  { %v76_v29 = vadd.f32 %v97_v23, %v67_v28 }
 0x151   :  { %78 = vst.msk [vmem:[#allocation5 + $0x8] sm:$0xff] %vm31_vm0, %v76_v29 }
 0x152   :  { %139 = shalt.err (!%p136_p12)
}
 0x153   :  { %s140_s5 = scalar_lea.hbm %s223_s3, 256 }
 0x154   :  { %p141_p13 = scmp.ne.s32.totalorder %s223_s3, %s140_s5  ;;  %p144_p0 = scmp.lt.u32.totalorder %s140_s5, %s223_s3 }
 0x156   :  { %p146_p1 = pnand %p144_p0, %p141_p13 }
 0x158   :  { %149 = shalt.err (!%p146_p1)
}
 0x159   :  { %90 = dma.vmem_to_hbm [thread:$0]  %s85_s30, 256, %s223_s3, [#allocation4], %s155_s22, %s155_s22, %s156_s23  }
 0x15a   :  { %152 = dma.done.wait [#allocation4], 256  }
 0x15b   :  { %153 = vsyncadd [#allocation4], 4294967040 }
 0x15c   :  { %94 = vsyncpa [#allocation3], 1 }
 0x15d   :  { %95 = vsyncpa [#allocation4], 1 }

</bundles_post_ra>
